<compile_context>
chip_gen: v7x
topology: tpu7x:2x2x1
jax: 0.10.0
libtpu: 0.0.40
codegen_flags: <defaults>
</compile_context>

<pallas_src>
import math

import jax
import jax.numpy as jnp
from jax.experimental import pallas as pl
from jax.experimental.pallas import tpu as pltpu


def _round_up(x, m):
    return ((x + m - 1) // m) * m


def _softplus_f32(x):
    # numerically stable softplus, evaluated in f32
    x = x.astype(jnp.float32)
    return jnp.maximum(x, 0.0) + jnp.log1p(jnp.exp(-jnp.abs(x)))


def _device_vmem_budget_bytes():
    """~75% of per-core VMEM: ~48 MiB on v7x, ~96 MiB on v5e/v6e."""
    try:
        cap = int(pltpu.get_tpu_info().vmem_capacity_bytes)
    except Exception:
        cap = 64 << 20  # conservative fallback = v7x per-TC VMEM
    return max(32 << 20, min((cap * 3) // 4, cap - (8 << 20)))


def _make_kernel(apply_softplus):
    def kernel(x_ref, w_ref, b_ref, o_ref, acc_ref):
        # x_ref  : (bb, bk)  input tile (MXU operand dtype)
        # w_ref  : (bk, bo)  weight tile in (IN, OUT) layout
        #                    apply_softplus=False -> already softplus'd
        #                    apply_softplus=True  -> raw parameter tile
        # b_ref  : (1, bo)   bias tile (f32)
        # o_ref  : (bb, bo)  output tile (resident across the K axis)
        # acc_ref: (bb, bo)  f32 accumulator scratch
        k = pl.program_id(2)

        @pl.when(k == 0)
        def _():
            acc_ref[...] = jnp.zeros_like(acc_ref)

        w = w_ref[...]
        if apply_softplus:
            # softplus in f32, then round to the MXU operand dtype.
            w = _softplus_f32(w).astype(x_ref.dtype)
        acc_ref[...] += jnp.dot(x_ref[...], w,
                                preferred_element_type=jnp.float32)

        @pl.when(k == pl.num_programs(2) - 1)
        def _():
            o_ref[...] = (acc_ref[...] + b_ref[...].astype(jnp.float32)
                          ).astype(o_ref.dtype)

    return kernel


def positive_linear(x, weight, bias=None, *, block_batch=None, block_out=None,
                    block_k=None, mxu_dtype=None, fuse_softplus=None):
    """PositiveLinear forward: x @ softplus(weight).T + bias.

    x:      (B, IN)
    weight: (OUT, IN)  raw (un-softplus'd) parameter
    bias:   (OUT,) or None
    returns (B, OUT) in x.dtype
    """
    B, IN = x.shape
    OUT, IN_w = weight.shape
    assert IN == IN_w, (IN, IN_w)
    if bias is None:
        bias = jnp.zeros((OUT,), jnp.float32)
    assert bias.shape == (OUT,)

    # MXU operand dtype: bf16 inputs stay bf16 (f32 accumulate); f32 stays f32.
    # mxu_dtype=jnp.bfloat16 may be forced explicitly (worth ~3x MXU + half the
    # DMA bytes on v5e) at a documented accuracy cost vs the f32 reference.
    if mxu_dtype is None:
        mxu_dtype = jnp.bfloat16 if x.dtype == jnp.bfloat16 else jnp.float32
    out_dtype = x.dtype
    batch_align = 16 if mxu_dtype == jnp.bfloat16 else 8

    # ---- block sizes --------------------------------------------------------
    # OUT tile: minimise OUT padding -- 128 unless round_up(OUT,128) is a
    # multiple of 256 (e.g. OUT=300 -> 3x128=384 tiles rather than 2x256=512).
    out_128 = _round_up(OUT, 128)
    if block_out is None:
        block_out = 256 if (out_128 % 256 == 0 and out_128 >= 256) else 128
    assert block_out % 128 == 0

    if block_batch is None:
        block_batch = min(_round_up(B, batch_align), 1024)
    assert block_batch % batch_align == 0, (
        f"block_batch must be a multiple of {batch_align} for {mxu_dtype}")

    if block_k is None:
        block_k = _round_up(IN, 128)  # fully-resident IN if the budget allows
    assert block_k % 128 == 0

    # Fuse softplus in-kernel only when each weight element is consumed by a
    # single batch tile; otherwise precompute softplus(W) once in the wrapper
    # (no per-revisit EUP work, no scratch dependence on the batch axis).
    if fuse_softplus is None:
        fuse_softplus = B <= block_batch
    w_sz = (jnp.dtype(weight.dtype).itemsize if fuse_softplus
            else jnp.dtype(mxu_dtype).itemsize)
    x_sz = jnp.dtype(mxu_dtype).itemsize
    o_sz = jnp.dtype(out_dtype).itemsize

    # ---- auto-shrink tiles under the device-derived VMEM budget -------------
    budget = _device_vmem_budget_bytes()

    def vmem_est(bb, bk, bo):
        return (2 * bb * bk * x_sz        # x tiles, double-buffered
                + 2 * bk * bo * w_sz      # weight tiles, double-buffered
                + 2 * bo * 4              # bias tiles
                + 2 * bb * bo * o_sz      # output tiles, double-buffered
                + bb * bo * 4)            # f32 accumulator scratch

    while vmem_est(block_batch, block_k, block_out) > budget:
        if block_k > 512:
            block_k = max(512, _round_up(block_k // 2, 128))
        elif block_batch > 128:
            block_batch = max(128, _round_up(block_batch // 2, batch_align))
        elif block_k > 128:
            block_k = max(128, _round_up(block_k // 2, 128))
        elif block_batch > batch_align:
            block_batch = max(batch_align,
                              _round_up(block_batch // 2, batch_align))
        elif block_out > 128:
            block_out = 128
        else:
            break  # minimal config; let the compiler manage the rest

    IN_p = _round_up(IN, block_k)
    OUT_p = _round_up(OUT, block_out)
    B_p = _round_up(B, block_batch)
    nb, nj, nk = B_p // block_batch, OUT_p // block_out, IN_p // block_k

    # ---- operand preparation (zero padding; padded rows/cols sliced off) ----
    x_p = jnp.pad(x.astype(mxu_dtype), ((0, B_p - B), (0, IN_p - IN)))

    # Weight presented in (IN, OUT) layout so the kernel dot needs no transpose.
    # TODO(synk): in a training loop, store the parameter pre-transposed as
    # (IN, OUT) (and cache softplus(W) for the non-fused path) so this
    # transpose/pad is not an extra HBM pass on every forward call.
    if fuse_softplus:
        w_in = jnp.pad(weight.T, ((0, IN_p - IN), (0, OUT_p - OUT)))
    else:
        w_pos = _softplus_f32(weight).astype(mxu_dtype)
        w_in = jnp.pad(w_pos.T, ((0, IN_p - IN), (0, OUT_p - OUT)))
    b_p = jnp.pad(bias.astype(jnp.float32), (0, OUT_p - OUT)).reshape(1, OUT_p)

    # ---- grid ordering: keep the larger operand resident across the inner ---
    # axis (batch-outer streams x once and re-reads the smaller W, and v.v.).
    batch_outer = B_p >= OUT_p
    if batch_outer:
        grid = (nb, nj, nk)
        x_map = lambda i, j, k: (i, k)
        w_map = lambda i, j, k: (k, j)
        b_map = lambda i, j, k: (0, j)
        o_map = lambda i, j, k: (i, j)
    else:
        grid = (nj, nb, nk)
        x_map = lambda j, i, k: (i, k)
        w_map = lambda j, i, k: (k, j)
        b_map = lambda j, i, k: (0, j)
        o_map = lambda j, i, k: (i, j)

    out_p = pl.pallas_call(
        _make_kernel(fuse_softplus),
        out_shape=jax.ShapeDtypeStruct((B_p, OUT_p), out_dtype),
        grid_spec=pltpu.PrefetchScalarGridSpec(
            num_scalar_prefetch=0,
            grid=grid,
            in_specs=[
                pl.BlockSpec((block_batch, block_k), x_map),
                pl.BlockSpec((block_k, block_out), w_map),
                pl.BlockSpec((1, block_out), b_map),
            ],
            out_specs=pl.BlockSpec((block_batch, block_out), o_map),
            scratch_shapes=[pltpu.VMEM((block_batch, block_out), jnp.float32)],
        ),
        compiler_params=pltpu.CompilerParams(
            # Only the K (contraction) axis carries the accumulator dependence;
            # batch and OUT axes are both megacore-shardable (v7x 2-TC).
            dimension_semantics=("parallel", "parallel", "arbitrary"),
            vmem_limit_bytes=int(budget),
        ),
    )(x_p, w_in, b_p)

    return out_p[:B, :OUT]


def init_positive_linear_params(key, in_features, out_features,
                                weight_init_offset=-2.0):
    """Deterministic re-implementation of PositiveLinear.reset_parameters."""
    kw, kb = jax.random.split(key)
    # kaiming_uniform_(a=sqrt(5)) on a (out, in) weight -> bound = 1/sqrt(fan_in)
    fan_in = in_features
    w_bound = 1.0 / math.sqrt(fan_in)
    weight = jax.random.uniform(
        kw, (out_features, in_features), jnp.float32, -w_bound, w_bound
    ) + weight_init_offset
    b_bound = 1.0 / math.sqrt(fan_in) if fan_in > 0 else 0.0
    bias = jax.random.uniform(kb, (out_features,), jnp.float32, -b_bound, b_bound)
    return weight, bias


def _reference(x, weight, bias):
    pos_w = jax.nn.softplus(weight.astype(jnp.float32))
    return (jnp.dot(x.astype(jnp.float32), pos_w.T,
                    precision=jax.lax.Precision.HIGHEST)
            + bias.astype(jnp.float32))


if __name__ == "__main__":
    key = jax.random.PRNGKey(0)

    # --- test 1: small module-sized shapes (nb=nj=nk=1, fused softplus) ------
    k_params, k_x, key = jax.random.split(key, 3)
    batch, in_features, out_features = 8, 32, 32
    weight, bias = init_positive_linear_params(k_params, in_features, out_features)
    x = jax.random.normal(k_x, (batch, in_features), jnp.float32)
    out = jax.block_until_ready(positive_linear(x, weight, bias))
    ref = _reference(x, weight, bias)
    assert out.shape == (batch, out_features)
    assert jnp.allclose(out, ref, atol=1e-3, rtol=1e-3)

    # --- test 2: padding + multi-tile grid incl. K-tiling (OUT-outer order) --
    k_params2, k_x2, key = jax.random.split(key, 3)
    batch2, in2, out2 = 40, 300, 300
    weight2, bias2 = init_positive_linear_params(k_params2, in2, out2)
    x2 = jax.random.normal(k_x2, (batch2, in2), jnp.float32)
    out_2 = jax.block_until_ready(
        positive_linear(x2, weight2, bias2,
                        block_batch=16, block_out=128, block_k=128))
    ref2 = _reference(x2, weight2, bias2)
    assert out_2.shape == (batch2, out2)
    assert jnp.allclose(out_2, ref2, atol=1e-3, rtol=1e-3)

    # --- test 3: B > OUT (batch-outer ordering, precomputed softplus) --------
    k_params3, k_x3, key = jax.random.split(key, 3)
    batch3, in3, out3 = 160, 64, 8
    weight3, bias3 = init_positive_linear_params(k_params3, in3, out3)
    x3 = jax.random.normal(k_x3, (batch3, in3), jnp.float32)
    out_3 = jax.block_until_ready(positive_linear(x3, weight3, bias3,
                                                  block_batch=32))
    ref3 = _reference(x3, weight3, bias3)
    assert jnp.allclose(out_3, ref3, atol=1e-3, rtol=1e-3)

    # --- test 4: bf16 operands (v5e-friendly path) ----------------------------
    x4 = x2.astype(jnp.bfloat16)
    out_4 = jax.block_until_ready(positive_linear(x4, weight2, bias2))
    w_pos_bf16 = jax.nn.softplus(weight2).astype(jnp.bfloat16).astype(jnp.float32)
    ref4 = (jnp.dot(x4.astype(jnp.float32), w_pos_bf16.T,
                    precision=jax.lax.Precision.HIGHEST) + bias2)
    assert jnp.allclose(out_4.astype(jnp.float32), ref4, atol=5e-2, rtol=5e-2)

    print("KERNEL_OK")
</pallas_src>

<mosaic_0001>
module attributes {stable_mosaic.version = 11 : i64} {
  func.func @kernel(%arg0: i32, %arg1: i32, %arg2: i32, %arg3: memref<8x128xf32, #tpu.memory_space<vmem>>, %arg4: memref<128x128xf32, #tpu.memory_space<vmem>>, %arg5: memref<1x128xf32, #tpu.memory_space<vmem>>, %arg6: memref<8x128xf32, #tpu.memory_space<vmem>>, %arg7: memref<8x128xf32, #tpu.memory_space<vmem>>) attributes {dimension_semantics = [#tpu.dimension_semantics<parallel>, #tpu.dimension_semantics<parallel>, #tpu.dimension_semantics<arbitrary>], iteration_bounds = array<i64: 1, 1, 1>, scalar_prefetch = 0 : i64, scratch_operands = 1 : i64, tpu.core_type = #tpu.core_type<tc>, window_params = [{transform_indices = @transform_0, window_bounds = array<i64: 8, 128>}, {transform_indices = @transform_1, window_bounds = array<i64: 128, 128>}, {transform_indices = @transform_2, window_bounds = array<i64: 1, 128>}, {transform_indices = @transform_3, window_bounds = array<i64: 8, 128>}]} {
    %c0_i32 = arith.constant 0 : i32
    %0 = arith.cmpi eq, %arg2, %c0_i32 : i32
    %1 = arith.extui %0 : i1 to i32
    %c0_i32_0 = arith.constant 0 : i32
    %2 = arith.cmpi ne, %1, %c0_i32_0 : i32
    scf.if %2 {
      %cst_12 = arith.constant 0.000000e+00 : f32
      %20 = vector.broadcast %cst_12 : f32 to vector<8x128xf32>
      %c0_13 = arith.constant 0 : index
      %c0_14 = arith.constant 0 : index
      %21 = vector.load %arg7[%c0_13, %c0_14] : memref<8x128xf32, #tpu.memory_space<vmem>>, vector<8x128xf32>
      tpu.vector_store %arg7[%c0_13, %c0_14], %20 {strides = array<i32>} : memref<8x128xf32, #tpu.memory_space<vmem>>, vector<8x128xf32>,
    } else {
    }
    %c0 = arith.constant 0 : index
    %c0_1 = arith.constant 0 : index
    %3 = vector.load %arg4[%c0, %c0_1] : memref<128x128xf32, #tpu.memory_space<vmem>>, vector<128x128xf32>
    %cst = arith.constant 0.000000e+00 : f32
    %4 = vector.broadcast %cst : f32 to vector<128x128xf32>
    %5 = arith.maximumf %3, %4 : vector<128x128xf32>
    %6 = math.absf %3 : vector<128x128xf32>
    %cst_2 = arith.constant 0.000000e+00 : f32
    %7 = vector.broadcast %cst_2 : f32 to vector<128x128xf32>
    %8 = arith.subf %7, %6 : vector<128x128xf32>
    %9 = math.exp %8 : vector<128x128xf32>
    %10 = math.log1p %9 : vector<128x128xf32>
    %11 = arith.addf %5, %10 : vector<128x128xf32>
    %c0_3 = arith.constant 0 : index
    %c0_4 = arith.constant 0 : index
    %12 = vector.load %arg7[%c0_3, %c0_4] : memref<8x128xf32, #tpu.memory_space<vmem>>, vector<8x128xf32>
    %c0_5 = arith.constant 0 : index
    %c0_6 = arith.constant 0 : index
    %13 = vector.load %arg3[%c0_5, %c0_6] : memref<8x128xf32, #tpu.memory_space<vmem>>, vector<8x128xf32>
    %cst_7 = arith.constant dense<0.000000e+00> : vector<8x128xf32>
    %14 = tpu.matmul %13, %11, %cst_7 {dimension_numbers = #tpu.dot_dimension_numbers<[1], [0], [0], [1], [0, 0, 1, 1], [], []>} : vector<8x128xf32>, vector<128x128xf32>, vector<8x128xf32> -> vector<8x128xf32>
    %15 = arith.addf %12, %14 : vector<8x128xf32>
    %c0_8 = arith.constant 0 : index
    %c0_9 = arith.constant 0 : index
    %16 = vector.load %arg7[%c0_8, %c0_9] : memref<8x128xf32, #tpu.memory_space<vmem>>, vector<8x128xf32>
    tpu.vector_store %arg7[%c0_8, %c0_9], %15 {strides = array<i32>} : memref<8x128xf32, #tpu.memory_space<vmem>>, vector<8x128xf32>,
    %c0_i32_10 = arith.constant 0 : i32
    %17 = arith.cmpi eq, %arg2, %c0_i32_10 : i32
    %18 = arith.extui %17 : i1 to i32
    %c0_i32_11 = arith.constant 0 : i32
    %19 = arith.cmpi ne, %18, %c0_i32_11 : i32
    scf.if %19 {
      %c0_12 = arith.constant 0 : index
      %c0_13 = arith.constant 0 : index
      %20 = vector.load %arg7[%c0_12, %c0_13] : memref<8x128xf32, #tpu.memory_space<vmem>>, vector<8x128xf32>
      %c0_14 = arith.constant 0 : index
      %c0_15 = arith.constant 0 : index
      %21 = vector.load %arg5[%c0_14, %c0_15] : memref<1x128xf32, #tpu.memory_space<vmem>>, vector<1x128xf32>
      %22 = vector.broadcast %21 : vector<1x128xf32> to vector<8x128xf32>
      %23 = arith.addf %20, %22 : vector<8x128xf32>
      %c0_16 = arith.constant 0 : index
      %c0_17 = arith.constant 0 : index
      %24 = vector.load %arg6[%c0_16, %c0_17] : memref<8x128xf32, #tpu.memory_space<vmem>>, vector<8x128xf32>
      tpu.vector_store %arg6[%c0_16, %c0_17], %23 {strides = array<i32>} : memref<8x128xf32, #tpu.memory_space<vmem>>, vector<8x128xf32>,
    } else {
    }
    return
  }
  func.func @transform_0(%arg0: i32, %arg1: i32, %arg2: i32) -> (i32, i32) {
    %c0_i32 = arith.constant 0 : i32
    return %arg1, %arg2 : i32, i32
  }
  func.func @transform_1(%arg0: i32, %arg1: i32, %arg2: i32) -> (i32, i32) {
    %c0_i32 = arith.constant 0 : i32
    return %arg2, %arg0 : i32, i32
  }
  func.func @transform_2(%arg0: i32, %arg1: i32, %arg2: i32) -> (i32, i32) {
    %c0_i32 = arith.constant 0 : i32
    %c0_i32_0 = arith.constant 0 : i32
    return %c0_i32, %arg0 : i32, i32
  }
  func.func @transform_3(%arg0: i32, %arg1: i32, %arg2: i32) -> (i32, i32) {
    %c0_i32 = arith.constant 0 : i32
    return %arg1, %arg0 : i32, i32
  }
}

</mosaic_0001>

<bundles_post_ra>
// kernel: tpu_custom_call.1
= control target key start
LH: loop header
LB: loop body
LE: loop exit
PB: predicated region body
PF: predicated region fallthrough
CT: control target
= control target key end

     0   :  { %8 = vsyncpa [#allocation4], 0  ;;  %s887_s0 = inlined_call_operand.hbm [shape: f32[8,128], index: 0, kind: input, shape index: {}]   ;;  %s888_s1 = inlined_call_operand.hbm [shape: f32[128,128], index: 1, kind: input, shape index: {}]   ;;  %s889_s2 = inlined_call_operand.vmem [shape: f32[1,128], index: 2, kind: input, shape index: {}]   ;;  %s890_s3 = inlined_call_operand.hbm [shape: f32[8,128], index: 3, kind: output, shape index: {}]  }
   0x1   :  { %9 = vsyncpa [#allocation7], 0 }
   0x2   :  { %10 = vsyncpa [#allocation5], 0  ;;  %s626_s12 = smov [#allocation3]   ;;  %s627_s14 = smov [#allocation6]  }
   0x3   :  { %s17_s13 = sshll.u32 %s626_s12, 4  ;;  %s26_s15 = sshll.u32 %s627_s14, 4  ;;  %s18_s13 = int_to_ptr.vmem [resolvable:$true] %s17_s13  ;;  %s654_s15 = int_to_ptr.vmem [resolvable:$true] %s26_s15 }
   0x4   :  { %s554_s18 = scalar_lea.hbm %s887_s0, 128 }
   0x5   :  { %p555_p0 = scmp.ne.s32.totalorder %s887_s0, %s554_s18  ;;  %p558_p1 = scmp.lt.u32.totalorder %s554_s18, %s887_s0 }
   0x7   :  { %p560_p2 = pnand %p558_p1, %p555_p0 }
   0x9   :  { %563 = shalt.err (!%p560_p2)
}
   0xa   :  { %s564_s23 = scalar_lea.vmem %s18_s13, 128  ;;  %p569_p4 = scmp.lt.s32.totalorder %s18_s13, %s18_s13 }
   0xb   :  { %p565_p3 = scmp.ne.s32.totalorder %s18_s13, %s564_s23  ;;  %p570_p5 = scmp.lt.s32.totalorder %s564_s23, %s564_s23 }
   0xd   :  { %p571_p6 = por %p570_p5, %p569_p4 }
   0xf   :  { %p572_p7 = pnand %p571_p6, %p565_p3 }
  0x11   :  { %575 = shalt.err (!%p572_p7)
}
  0x12   :  { %20 = dma.hbm_to_vmem [thread:$0]  %s887_s0, 128, %s18_s13, [#allocation4]  }
  0x13   :  { %s576_s28 = scalar_lea.hbm %s888_s1, 2048 }
  0x14   :  { %p577_p8 = scmp.ne.s32.totalorder %s888_s1, %s576_s28  ;;  %p580_p9 = scmp.lt.u32.totalorder %s576_s28, %s888_s1 }
  0x16   :  { %p582_p10 = pnand %p580_p9, %p577_p8 }
  0x18   :  { %585 = shalt.err (!%p582_p10)
}
  0x19   :  { %s586_s6 = scalar_lea.vmem %s654_s15, 2048  ;;  %p591_p12 = scmp.lt.s32.totalorder %s654_s15, %s654_s15 }
  0x1a   :  { %p587_p11 = scmp.ne.s32.totalorder %s654_s15, %s586_s6  ;;  %p592_p13 = scmp.lt.s32.totalorder %s586_s6, %s586_s6 }
  0x1c   :  { %p593_p0 = por %p592_p13, %p591_p12 }
  0x1e   :  { %p594_p1 = pnand %p593_p0, %p587_p11 }
  0x20   :  { %597 = shalt.err (!%p594_p1)
}
  0x21   :  { %s628_s0 = smov 128   ;;  %s629_s7 = smov 8  }
  0x22   :  { %32 = dma.hbm_to_vmem [thread:$0]  %s888_s1, 2048, %s654_s15, [#allocation7], %s628_s0, %s628_s0, %s629_s7  }
  0x23   :  { %620 = dma.done.wait [#allocation4], 128  }
  0x24   :  { %621 = vsyncadd [#allocation4], 4294967168 }
  0x25   :  { %622 = dma.done.wait [#allocation7], 2048  }
  0x26   :  { %623 = vsyncadd [#allocation7], 4294965248  ;;  %v630_v0 = vmov 0.0|0.0   ;;  %vm631_vm0 = vmmov 0   ;;  %v632_v1 = vmov 0.0   ;;  %v686_v2 = vld [vmem:[#allocation6] sm:$0xff] }
  0x27   :  { %458 = vmatprep.subr.bf16.mxu0 %v630_v0  ;;  %455 = vmatprep.mubr.msk.f32.mxu0 %vm631_vm0, %v632_v1  ;;  %v688_v3 = vld [vmem:[#allocation6 + $0x8] sm:$0xff]  ;;  %v690_v4 = vld [vmem:[#allocation6 + $0x10] sm:$0xff]  ;;  %v78_v5 = vand.u32 2147483647, %v686_v2  ;;  %v694_v7 = vld [vmem:[#allocation6 + $0x18] sm:$0xff]  ;;  %v62_v44 = vmax.f32 %v686_v2, 0.0 }
  0x28   :  { %v79_v6 = vand.u32 2147483647, %v688_v3  ;;  %v80_v8 = vand.u32 2147483647, %v690_v4  ;;  %v697_v9 = vld [vmem:[#allocation6 + $0x20] sm:$0xff]  ;;  %v700_v13 = vld [vmem:[#allocation6 + $0x28] sm:$0xff] }
  0x29   :  { %v94_v10 = vsub.f32 0.0, %v78_v5  ;;  %v81_v12 = vand.u32 2147483647, %v694_v7  ;;  %v82_v15 = vand.u32 2147483647, %v697_v9  ;;  %v703_v16 = vld [vmem:[#allocation6 + $0x30] sm:$0xff] }
  0x2a   :  { %v95_v11 = vsub.f32 0.0, %v79_v6  ;;  %v96_v14 = vsub.f32 0.0, %v80_v8  ;;  %v705_v17 = vld [vmem:[#allocation6 + $0x38] sm:$0xff]  ;;  %v83_v22 = vand.u32 2147483647, %v700_v13  ;;  %v710_v29 = vld [vmem:[#allocation6 + $0x40] sm:$0xff] }
  0x2b   :  { %v110_v18 = vmul.f32 1.442695, %v94_v10  ;;  %v97_v20 = vsub.f32 0.0, %v81_v12  ;;  %v98_v23 = vsub.f32 0.0, %v82_v15  ;;  %v84_v25 = vand.u32 2147483647, %v703_v16 }
  0x2c   :  { %v112_v19 = vmul.f32 1.442695, %v95_v11  ;;  %v114_v21 = vmul.f32 1.442695, %v96_v14  ;;  %v85_v26 = vand.u32 2147483647, %v705_v17 }
  0x2d   :  { %490 = vpow2.f32 %v110_v18  ;;  %v116_v24 = vmul.f32 1.442695, %v97_v20  ;;  %v99_v27 = vsub.f32 0.0, %v83_v22  ;;  %v118_v28 = vmul.f32 1.442695, %v98_v23  ;;  %v712_v30 = vld [vmem:[#allocation6 + $0x48] sm:$0xff] }
  0x2e   :  { %492 = vpow2.f32 %v112_v19  ;;  %v100_v31 = vsub.f32 0.0, %v84_v25  ;;  %v101_v32 = vsub.f32 0.0, %v85_v26  ;;  %v86_v34 = vand.u32 2147483647, %v710_v29  ;;  %v715_v35 = vld [vmem:[#allocation6 + $0x50] sm:$0xff]  ;;  %v717_v36 = vld [vmem:[#allocation6 + $0x58] sm:$0xff] }
  0x2f   :  { %494 = vpow2.f32 %v114_v21  ;;  %v120_v33 = vmul.f32 1.442695, %v99_v27  ;;  %v87_v38 = vand.u32 2147483647, %v712_v30  ;;  %v88_v42 = vand.u32 2147483647, %v715_v35 }
  0x30   :  { %496 = vpow2.f32 %v116_v24  ;;  %v122_v37 = vmul.f32 1.442695, %v100_v31  ;;  %v124_v39 = vmul.f32 1.442695, %v101_v32  ;;  %v102_v40 = vsub.f32 0.0, %v86_v34  ;;  %v723_v46 = vld [vmem:[#allocation6 + $0x60] sm:$0xff] }
  0x31   :  { %498 = vpow2.f32 %v118_v28  ;;  %v103_v41 = vsub.f32 0.0, %v87_v38  ;;  %v89_v43 = vand.u32 2147483647, %v717_v36  ;;  %v63_v47 = vmax.f32 %v688_v3, 0.0  ;;  %v727_v51 = vld [vmem:[#allocation6 + $0x68] sm:$0xff]  ;;  %s633_s11 = smov [#allocation8]  }
  0x32   :  { %500 = vpow2.f32 %v120_v33  ;;  %v126_v45 = vmul.f32 1.442695, %v102_v40  ;;  %v64_v48 = vmax.f32 %v690_v4, 0.0  ;;  %v104_v50 = vsub.f32 0.0, %v88_v42  ;;  %s395_s12 = sshll.u32 %s633_s11, 4  ;;  %s396_s12 = int_to_ptr.vmem [resolvable:$true] %s395_s12 }
  0x33   :  { %502 = vpow2.f32 %v122_v37  ;;  %v128_v49 = vmul.f32 1.442695, %v103_v41  ;;  %v65_v52 = vmax.f32 %v694_v7, 0.0  ;;  %v66_v53 = vmax.f32 %v697_v9, 0.0  ;;  %s598_s13 = scalar_lea.vmem %s396_s12, 128  ;;  %p603_p3 = scmp.lt.s32.totalorder %s396_s12, %s396_s12 }
  0x34   :  { %v67_v54 = vmax.f32 %v700_v13, 0.0  ;;  %504 = vpow2.f32 %v124_v39  ;;  %v105_v56 = vsub.f32 0.0, %v89_v43  ;;  %v130_v57 = vmul.f32 1.442695, %v104_v50  ;;  %p599_p2 = scmp.ne.s32.totalorder %s396_s12, %s598_s13  ;;  %p604_p4 = scmp.lt.s32.totalorder %s598_s13, %s598_s13 }
  0x35   :  { %506 = vpow2.f32 %v126_v45  ;;  %v90_v58 = vand.u32 2147483647, %v723_v46  ;;  %v91_v62 = vand.u32 2147483647, %v727_v51  ;;  %v68_v11 = vmax.f32 %v703_v16, 0.0 }
  0x36   :  { %508 = vpow2.f32 %v128_v49  ;;  %v69_v12 = vmax.f32 %v705_v17, 0.0  ;;  %v736_v18 = vmul.f32 1.442695, %v105_v56  ;;  %v71_v17 = vmax.f32 %v712_v30, 0.0  ;;  %p605_p5 = por %p604_p4, %p603_p3 }
  0x37   :  { %v491_v55 = vpop.eup %490  ;;  %510 = vpow2.f32 %v130_v57  ;;  %v738_v19 = vsub.f32 0.0, %v90_v58  ;;  %v740_v22 = vsub.f32 0.0, %v91_v62 }
  0x38   :  { %v493_v59 = vpop.eup %492  ;;  %v142_v60 = vadd.f32 1.0, %v491_v55  ;;  %v145_v61 = vmul.f32 -0.5, %v491_v55  ;;  %v148_v1 = vand.u32 2147483647, %v491_v55  ;;  %p606_p6 = pnand %p605_p5, %p599_p2 }
  0x39   :  { %v495_v63 = vpop.eup %494  ;;  %v151_v5 = vadd.f32 1.0, %v493_v59  ;;  %v154_v6 = vmul.f32 -0.5, %v493_v59  ;;  %v157_v20 = vand.u32 2147483647, %v493_v59 }
  0x3a   :  { %v497_v8 = vpop.eup %496  ;;  %512 = vlog2.f32 %v142_v60  ;;  %v160_v10 = vadd.f32 1.0, %v495_v63  ;;  %v163_v15 = vmul.f32 -0.5, %v495_v63  ;;  %v146_v24 = vadd.f32 1.0, %v145_v61 }
  0x3b   :  { %v499_v14 = vpop.eup %498  ;;  %514 = vlog2.f32 %v151_v5  ;;  %v169_v21 = vadd.f32 1.0, %v497_v8  ;;  %vm742_vm1 = vcmp.lt.f32.partialorder %v148_v1, 0.0004427343  ;;  %v155_v26 = vadd.f32 1.0, %v154_v6 }
  0x3c   :  { %516 = vlog2.f32 %v160_v10  ;;  %v501_v23 = vpop.eup %500  ;;  %v172_v27 = vmul.f32 -0.5, %v497_v8  ;;  %v166_v31 = vand.u32 2147483647, %v495_v63  ;;  %v178_v32 = vadd.f32 1.0, %v499_v14 }
  0x3d   :  { %v746_v28 = vpop.eup %502  ;;  %518 = vlog2.f32 %v169_v21  ;;  %v181_v33 = vmul.f32 -0.5, %v499_v14  ;;  %v164_v34 = vadd.f32 1.0, %v163_v15  ;;  %v175_v38 = vand.u32 2147483647, %v497_v8 }
  0x3e   :  { %v173_v37 = vadd.f32 1.0, %v172_v27  ;;  %v184_v39 = vand.u32 2147483647, %v499_v14  ;;  %v748_v40 = vpop.eup %504  ;;  %520 = vlog2.f32 %v178_v32  ;;  %v187_v42 = vadd.f32 1.0, %v501_v23 }
  0x3f   :  { %v182_v41 = vadd.f32 1.0, %v181_v33  ;;  %v190_v43 = vmul.f32 -0.5, %v501_v23  ;;  %v750_v45 = vpop.eup %506  ;;  %v147_v49 = vmul.f32 %v491_v55, %v146_v24  ;;  %v156_v50 = vmul.f32 %v493_v59, %v155_v26 }
  0x40   :  { %vm752_vm2 = vcmp.lt.f32.partialorder %v157_v20, 0.0004427343  ;;  %v196_v57 = vadd.f32 1.0, %v746_v28  ;;  %v757_v58 = vpop.eup %508  ;;  %vm759_vm3 = vcmp.lt.f32.partialorder %v166_v31, 0.0004427343  ;;  %522 = vlog2.f32 %v187_v42 }
  0x41   :  { %v191_v61 = vadd.f32 1.0, %v190_v43  ;;  %v193_v62 = vand.u32 2147483647, %v501_v23  ;;  %v763_v1 = vpop.eup %510  ;;  %v165_v5 = vmul.f32 %v495_v63, %v164_v34  ;;  %vm765_vm4 = vcmp.lt.f32.partialorder %v175_v38, 0.0004427343 }
  0x42   :  { %524 = vlog2.f32 %v196_v57  ;;  %v205_v59 = vadd.f32 1.0, %v748_v40  ;;  %v174_v10 = vmul.f32 %v497_v8, %v173_v37  ;;  %v183_v15 = vmul.f32 %v499_v14, %v182_v41 }
  0x43   :  { %vm770_vm5 = vcmp.lt.f32.partialorder %v184_v39, 0.0004427343  ;;  %v199_v21 = vmul.f32 -0.5, %v746_v28  ;;  %v202_v63 = vand.u32 2147483647, %v746_v28  ;;  %v214_v27 = vadd.f32 1.0, %v750_v45 }
  0x44   :  { %v513_v6 = vpop.eup %512  ;;  %526 = vlog2.f32 %v205_v59  ;;  %v192_v33 = vmul.f32 %v501_v23, %v191_v61  ;;  %vm777_vm6 = vcmp.lt.f32.partialorder %v193_v62, 0.0004427343  ;;  %v208_v8 = vmul.f32 -0.5, %v748_v40 }
  0x45   :  { %v515_v24 = vpop.eup %514  ;;  %v144_v26 = vmul.f32 0.6931472, %v513_v6  ;;  %528 = vlog2.f32 %v214_v27  ;;  %v217_v38 = vmul.f32 -0.5, %v750_v45  ;;  %v200_v42 = vadd.f32 1.0, %v199_v21 }
  0x46   :  { %v517_v31 = vpop.eup %516  ;;  %v153_v32 = vmul.f32 0.6931472, %v515_v24  ;;  %v211_v43 = vand.u32 2147483647, %v748_v40  ;;  %vm794_vm7 = vcmp.lt.f32.partialorder %v202_v63, 0.0004427343 }
  0x47   :  { %v150_v14 = vsel %vm742_vm1, %v147_v49, %v144_v26  ;;  %v162_v37 = vmul.f32 0.6931472, %v517_v31  ;;  %v519_v39 = vpop.eup %518  ;;  %v209_v2 = vadd.f32 1.0, %v208_v8  ;;  %v223_v56 = vadd.f32 1.0, %v757_v58 }
  0x48   :  { %v159_v41 = vsel %vm752_vm2, %v156_v50, %v153_v32  ;;  %v286_v23 = vadd.f32 %v150_v14, %v62_v44  ;;  %v171_v49 = vmul.f32 0.6931472, %v519_v39  ;;  %v521_v62 = vpop.eup %520  ;;  %v220_v44 = vand.u32 2147483647, %v750_v45  ;;  %v831_v32 = vld [vmem:[#allocation6 + $0x70] sm:$0xff]  ;;  %v837_v14 = vld [vmem:[#allocation6 + $0x78] sm:$0xff] }
  0x49   :  { %v287_v57 = vadd.f32 %v159_v41, %v63_v47  ;;  %v168_v25 = vsel %vm759_vm3, %v165_v5, %v162_v37  ;;  %v180_v47 = vmul.f32 0.6931472, %v521_v62  ;;  %v218_v60 = vadd.f32 1.0, %v217_v38 }
  0x4a   :  { %v288_v50 = vadd.f32 %v168_v25, %v64_v48  ;;  %v177_v3 = vsel %vm765_vm4, %v174_v10, %v171_v49  ;;  %v523_v5 = vpop.eup %522  ;;  %v201_v21 = vmul.f32 %v746_v28, %v200_v42  ;;  %530 = vlog2.f32 %v223_v56 }
  0x4b   :  { %v459_v59 = vpack.c.bf16 %v287_v57, %v286_v23  ;;  %v289_v6 = vadd.f32 %v177_v3, %v65_v52  ;;  %v226_v4 = vmul.f32 -0.5, %v757_v58  ;;  %v186_v24 = vsel %vm770_vm5, %v183_v15, %v180_v47 }
  0x4c   :  { %v525_v48 = vpop.eup %524  ;;  %v189_v26 = vmul.f32 0.6931472, %v523_v5  ;;  %532 = vpow2.f32 %v736_v18  ;;  %v232_v55 = vadd.f32 1.0, %v763_v1  ;;  %v290_v7 = vadd.f32 %v186_v24, %v66_v53 }
  0x4d   :  { %460 = vmatpush3.bf16.msra.mxu0 %v459_v59  ;;  %v462_v10 = vpack.c.bf16 %v289_v6, %v288_v50  ;;  %v198_v52 = vmul.f32 0.6931472, %v525_v48  ;;  %v210_v28 = vmul.f32 %v748_v40, %v209_v2  ;;  %vm818_vm8 = vcmp.lt.f32.partialorder %v211_v43, 0.0004427343 }
  0x4e   :  { %461 = vmatprep.subr.bf16.mxu0 %v630_v0  ;;  %v527_v63 = vpop.eup %526  ;;  %v195_v27 = vsel %vm777_vm6, %v192_v33, %v189_v26  ;;  %v219_v18 = vmul.f32 %v750_v45, %v218_v60  ;;  %vm823_vm9 = vcmp.lt.f32.partialorder %v220_v44, 0.0004427343  ;;  %v227_v31 = vadd.f32 1.0, %v226_v4 }
  0x4f   :  { %v291_v9 = vadd.f32 %v195_v27, %v67_v54  ;;  %v204_v53 = vsel %vm794_vm7, %v201_v21, %v198_v52  ;;  %v207_v40 = vmul.f32 0.6931472, %v527_v63  ;;  %v529_v33 = vpop.eup %528  ;;  %534 = vlog2.f32 %v232_v55 }
  0x50   :  { %v292_v34 = vadd.f32 %v204_v53, %v68_v11  ;;  %v134_v45 = vmul.f32 1.442695, %v738_v19  ;;  %v136_v8 = vmul.f32 1.442695, %v740_v22  ;;  %v216_v37 = vmul.f32 0.6931472, %v529_v33 }
  0x51   :  { %463 = vmatpush3.bf16.msra.mxu0 %v462_v10  ;;  %v465_v13 = vpack.c.bf16 %v291_v9, %v290_v7  ;;  %v213_v54 = vsel %vm818_vm8, %v210_v28, %v207_v40  ;;  %v229_v38 = vand.u32 2147483647, %v757_v58  ;;  %v92_v11 = vand.u32 2147483647, %v831_v32 }
  0x52   :  { %464 = vmatprep.subr.bf16.mxu0 %v630_v0  ;;  %v293_v16 = vadd.f32 %v213_v54, %v69_v12  ;;  %536 = vpow2.f32 %v134_v45  ;;  %v70_v19 = vmax.f32 %v710_v29, 0.0  ;;  %v93_v22 = vand.u32 2147483647, %v837_v14 }
  0x53   :  { %538 = vpow2.f32 %v136_v8  ;;  %v222_v41 = vsel %vm823_vm9, %v219_v18, %v216_v37  ;;  %v228_v23 = vmul.f32 %v757_v58, %v227_v31  ;;  %v108_v42 = vsub.f32 0.0, %v92_v11 }
  0x54   :  { %v468_v39 = vpack.c.bf16 %v293_v16, %v292_v34  ;;  %v531_v43 = vpop.eup %530  ;;  %vm230_vm10 = vcmp.lt.f32.partialorder %v229_v38, 0.0004427343  ;;  %v235_v12 = vmul.f32 -0.5, %v763_v1  ;;  %v109_v29 = vsub.f32 0.0, %v93_v22 }
  0x55   :  { %466 = vmatpush3.bf16.msra.mxu0 %v465_v13  ;;  %v225_v25 = vmul.f32 0.6931472, %v531_v43  ;;  %v138_v49 = vmul.f32 1.442695, %v108_v42  ;;  %v294_v61 = vadd.f32 %v222_v41, %v70_v19  ;;  %v238_v30 = vand.u32 2147483647, %v763_v1 }
  0x56   :  { %467 = vmatprep.subr.bf16.mxu0 %v630_v0  ;;  %v533_v57 = vpop.eup %532  ;;  %v140_v50 = vmul.f32 1.442695, %v109_v29  ;;  %v236_v44 = vadd.f32 1.0, %v235_v12  ;;  %v72_v55 = vmax.f32 %v715_v35, 0.0  ;;  %v73_v27 = vmax.f32 %v717_v36, 0.0 }
  0x57   :  { %v241_v62 = vadd.f32 1.0, %v533_v57  ;;  %v231_v2 = vsel %vm230_vm10, %v228_v23, %v225_v25  ;;  %540 = vpow2.f32 %v138_v49  ;;  %v244_v59 = vmul.f32 -0.5, %v533_v57 }
  0x58   :  { %v295_v58 = vadd.f32 %v231_v2, %v71_v17  ;;  %v237_v6 = vmul.f32 %v763_v1, %v236_v44  ;;  %vm858_vm11 = vcmp.lt.f32.partialorder %v238_v30, 0.0004427343  ;;  %v247_v26 = vand.u32 2147483647, %v533_v57 }
  0x59   :  { %469 = vmatpush3.bf16.msra.mxu0 %v468_v39  ;;  %542 = vlog2.f32 %v241_v62  ;;  %v535_v56 = vpop.eup %534  ;;  %v245_v48 = vadd.f32 1.0, %v244_v59  ;;  %v74_v36 = vmax.f32 %v723_v46, 0.0  ;;  %v75_v19 = vmax.f32 %v727_v51, 0.0 }
  0x5a   :  { %470 = vmatprep.subr.bf16.mxu0 %v630_v0  ;;  %544 = vpow2.f32 %v140_v50  ;;  %v471_v3 = vpack.c.bf16 %v295_v58, %v294_v61  ;;  %v234_v5 = vmul.f32 0.6931472, %v535_v56  ;;  %vm248_vm12 = vcmp.lt.f32.partialorder %v247_v26, 0.0004427343 }
  0x5b   :  { %v246_v28 = vmul.f32 %v533_v57, %v245_v48  ;;  %v76_v49 = vmax.f32 %v831_v32, 0.0  ;;  %v77_v2 = vmax.f32 %v837_v14, 0.0  ;;  %v405_v32 = vld [vmem:[%s889_s2] ss:$0 sm:$0xff] }
  0x5c   :  { %v537_v47 = vpop.eup %536  ;;  %v240_v7 = vsel %vm858_vm11, %v237_v6, %v234_v5 }
  0x5d   :  { %v539_v60 = vpop.eup %538  ;;  %472 = vmatpush3.bf16.msra.mxu0 %v471_v3  ;;  %v250_v21 = vadd.f32 1.0, %v537_v47  ;;  %v253_v10 = vmul.f32 -0.5, %v537_v47  ;;  %v296_v9 = vadd.f32 %v240_v7, %v72_v55  ;;  %v256_v40 = vand.u32 2147483647, %v537_v47 }
  0x5e   :  { %473 = vmatprep.subr.bf16.mxu0 %v630_v0  ;;  %v259_v24 = vadd.f32 1.0, %v539_v60  ;;  %v262_v52 = vmul.f32 -0.5, %v539_v60  ;;  %v265_v34 = vand.u32 2147483647, %v539_v60 }
  0x5f   :  { %546 = vlog2.f32 %v250_v21  ;;  %v254_v53 = vadd.f32 1.0, %v253_v10  ;;  %vm257_vm13 = vcmp.lt.f32.partialorder %v256_v40, 0.0004427343 }
  0x60   :  { %548 = vlog2.f32 %v259_v24  ;;  %v263_v31 = vadd.f32 1.0, %v262_v52  ;;  %vm266_vm14 = vcmp.lt.f32.partialorder %v265_v34, 0.0004427343 }
  0x61   :  { %v541_v1 = vpop.eup %540  ;;  %v255_v13 = vmul.f32 %v537_v47, %v254_v53  ;;  %v303_v47 = vld [vmem:[#allocation3] sm:$0xff] }
  0x62   :  { %v268_v15 = vadd.f32 1.0, %v541_v1  ;;  %v271_v45 = vmul.f32 -0.5, %v541_v1  ;;  %v264_v16 = vmul.f32 %v539_v60, %v263_v31  ;;  %v274_v23 = vand.u32 2147483647, %v541_v1 }
  0x63   :  { %v543_v63 = vpop.eup %542 }
  0x64   :  { %v545_v18 = vpop.eup %544  ;;  %v243_v20 = vmul.f32 0.6931472, %v543_v63  ;;  %550 = vlog2.f32 %v268_v15  ;;  %v272_v39 = vadd.f32 1.0, %v271_v45  ;;  %vm275_vm15 = vcmp.lt.f32.partialorder %v274_v23, 0.0004427343 }
  0x65   :  { %v277_v35 = vadd.f32 1.0, %v545_v18  ;;  %v280_v54 = vmul.f32 -0.5, %v545_v18  ;;  %v283_v29 = vand.u32 2147483647, %v545_v18 }
  0x66   :  { %v249_v33 = vsel %vm248_vm12, %v246_v28, %v243_v20  ;;  %v273_v46 = vmul.f32 %v541_v1, %v272_v39 }
  0x67   :  { %v297_v8 = vadd.f32 %v249_v33, %v73_v27  ;;  %552 = vlog2.f32 %v277_v35  ;;  %v281_v43 = vadd.f32 1.0, %v280_v54  ;;  %vm284_vm0 = vcmp.lt.f32.partialorder %v283_v29, 0.0004427343 }
  0x69   :  { %v547_v37 = vpop.eup %546  ;;  %v474_v38 = vpack.c.bf16 %v297_v8, %v296_v9  ;;  %v282_v62 = vmul.f32 %v545_v18, %v281_v43 }
  0x6a   :  { %v549_v11 = vpop.eup %548  ;;  %v252_v22 = vmul.f32 0.6931472, %v547_v37 }
  0x6b   :  { %475 = vmatpush3.bf16.msra.mxu0 %v474_v38  ;;  %v261_v41 = vmul.f32 0.6931472, %v549_v11 }
  0x6c   :  { %476 = vmatprep.subr.bf16.mxu0 %v630_v0  ;;  %v258_v42 = vsel %vm257_vm13, %v255_v13, %v252_v22 }
  0x6d   :  { %v267_v17 = vsel %vm266_vm14, %v264_v16, %v261_v41  ;;  %v298_v12 = vadd.f32 %v258_v42, %v74_v36 }
  0x6e   :  { %v299_v57 = vadd.f32 %v267_v17, %v75_v19  ;;  %v551_v25 = vpop.eup %550 }
  0x6f   :  { %v270_v61 = vmul.f32 0.6931472, %v551_v25 }
  0x70   :  { %v477_v51 = vpack.c.bf16 %v299_v57, %v298_v12 }
  0x71   :  { %v553_v50 = vpop.eup %552  ;;  %v276_v58 = vsel %vm275_vm15, %v273_v46, %v270_v61 }
  0x72   :  { %478 = vmatpush3.bf16.msra.mxu0 %v477_v51  ;;  %v279_v44 = vmul.f32 0.6931472, %v553_v50  ;;  %v300_v56 = vadd.f32 %v276_v58, %v76_v49 }
  0x73   :  { %479 = vmatprep.subr.bf16.mxu0 %v630_v0 }
  0x74   :  { %v285_v30 = vsel %vm284_vm0, %v282_v62, %v279_v44 }
  0x75   :  { %v301_v59 = vadd.f32 %v285_v30, %v77_v2 }
  0x77   :  { %v480_v3 = vpack.c.bf16 %v301_v59, %v300_v56 }
  0x79   :  { %481 = vmatpush3.bf16.msra.mxu0 %v480_v3 }
  0x7c   :  { %456 = vmatmul.mubr.f32.vlgmr.msra.gmra.mrb[0].mxu0 %v303_v47 }
 0x14f   :  { %v370_v14 = vpop.f32.mrb[0].mxu0 }
 0x150   :  { %v387_v60 = vadd.f32 %v405_v32, %v370_v14  ;;  %v457_v5 = vpop.f32.mrb[1].mxu0 }
 0x152   :  { %388 = vst [vmem:[#allocation8] sm:$0xff] %v387_v60 }
 0x153   :  { %609 = shalt.err (!%p606_p6)
}
 0x154   :  { %s610_s16 = scalar_lea.hbm %s890_s3, 128 }
 0x155   :  { %p611_p7 = scmp.ne.s32.totalorder %s890_s3, %s610_s16  ;;  %p614_p8 = scmp.lt.u32.totalorder %s610_s16, %s890_s3 }
 0x157   :  { %p616_p9 = pnand %p614_p8, %p611_p7 }
 0x159   :  { %619 = shalt.err (!%p616_p9)
}
 0x15a   :  { %398 = dma.vmem_to_hbm [thread:$0]  %s396_s12, 128, %s890_s3, [#allocation5]  }
 0x15b   :  { %624 = dma.done.wait [#allocation5], 128  }
 0x15c   :  { %625 = vsyncadd [#allocation5], 4294967168 }
 0x15d   :  { %402 = vsyncpa [#allocation4], 1 }
 0x15e   :  { %403 = vsyncpa [#allocation7], 1 }
 0x15f   :  { %404 = vsyncpa [#allocation5], 1 }

</bundles_post_ra>
